<compile_context>
chip_gen: v5e
topology: v5e:2x2
jax: 0.10.0
libtpu: 0.0.40
codegen_flags: <defaults>
</compile_context>

<pallas_src>
import functools

import jax
import jax.numpy as jnp
from jax.experimental import pallas as pl
from jax.experimental.pallas import tpu as pltpu


_MASK_VALUE = -1e30


def _round_up(n: int, m: int) -> int:
    return ((n + m - 1) // m) * m


def _project_kernel(x_ref, wq_ref, wk_ref, wv_ref, q_ref, k_ref, v_ref, *, scale):
    """Fused Q/K/V projection for one block of rows; scale folded into Q."""
    x = x_ref[...]
    q = jnp.dot(x, wq_ref[...], preferred_element_type=jnp.float32)
    q_ref[...] = (q * scale).astype(q_ref.dtype)
    k = jnp.dot(x, wk_ref[...], preferred_element_type=jnp.float32)
    k_ref[...] = k.astype(k_ref.dtype)
    v = jnp.dot(x, wv_ref[...], preferred_element_type=jnp.float32)
    v_ref[...] = v.astype(v_ref.dtype)


def _flash_attn_kernel(q_ref, k_ref, v_ref, o_ref, m_sc, l_sc, acc_sc,
                       *, seq, block_k, need_mask, approx_recip):
    ki = pl.program_id(1)

    @pl.when(ki == 0)
    def _init():
        m_sc[...] = jnp.full_like(m_sc, _MASK_VALUE)
        l_sc[...] = jnp.zeros_like(l_sc)
        acc_sc[...] = jnp.zeros_like(acc_sc)

    # scores[j, i] = q[j] . k[i] — contract the feature axes directly (no XLU
    # transpose), f32 MXU accumulation.
    s = jax.lax.dot_general(
        q_ref[...], k_ref[...],
        dimension_numbers=(((1,), (1,)), ((), ())),
        preferred_element_type=jnp.float32,
    )

    if need_mask:  # static Python bool: only emitted when seq was padded
        key_idx = ki * block_k + jax.lax.broadcasted_iota(jnp.int32, s.shape, 1)
        s = jnp.where(key_idx < seq, s, _MASK_VALUE)

    # Online softmax over the key axis; stats kept in f32.
    m_prev = m_sc[...]
    m_new = jnp.maximum(m_prev, jnp.max(s, axis=1, keepdims=True))
    alpha = jnp.exp(m_prev - m_new)
    p = jnp.exp(s - m_new)  # unnormalized weights

    l_sc[...] = alpha * l_sc[...] + jnp.sum(p, axis=1, keepdims=True)
    acc_sc[...] = alpha * acc_sc[...] + jnp.dot(
        p.astype(v_ref.dtype), v_ref[...], preferred_element_type=jnp.float32)
    m_sc[...] = m_new

    @pl.when(ki == pl.num_programs(1) - 1)
    def _finalize():
        # Deferred normalization: one reciprocal per query row, broadcast multiply.
        inv_l = pl.reciprocal(l_sc[...], approx=approx_recip)
        o_ref[...] = (acc_sc[...] * inv_l).astype(o_ref.dtype)


def self_attention(x, w_query, w_key, w_value, *, block_seq=512,
                   compute_dtype=jnp.bfloat16):
    seq, d_in = x.shape
    d_out_kq = w_query.shape[1]
    d_out_v = w_value.shape[1]
    assert w_key.shape == (d_in, d_out_kq) and w_value.shape == (d_in, d_out_v)

    cdt = jnp.dtype(compute_dtype)
    f32 = jnp.float32

    # Pad feature dims to multiples of 128 (lane width); pad seq to the block size.
    d_in_p = _round_up(d_in, 128)
    dkq_p = _round_up(d_out_kq, 128)
    dv_p = _round_up(d_out_v, 128)
    blk = min(block_seq, _round_up(seq, 8))
    seq_p = _round_up(seq, blk)
    n_blk = seq_p // blk

    xp = jnp.pad(x.astype(f32), ((0, seq_p - seq), (0, d_in_p - d_in))).astype(cdt)
    wq = jnp.pad(w_query.astype(f32), ((0, d_in_p - d_in), (0, dkq_p - d_out_kq))).astype(cdt)
    wk = jnp.pad(w_key.astype(f32), ((0, d_in_p - d_in), (0, dkq_p - d_out_kq))).astype(cdt)
    wv = jnp.pad(w_value.astype(f32), ((0, d_in_p - d_in), (0, dv_p - d_out_v))).astype(cdt)

    scale = 1.0 / (float(d_out_kq) ** 0.5)  # original (unpadded) d_out_kq

    # ---- kernel 1: fused Q/K/V projection; weights resident across the grid.
    q, k, v = pl.pallas_call(
        functools.partial(_project_kernel, scale=scale),
        out_shape=(
            jax.ShapeDtypeStruct((seq_p, dkq_p), cdt),
            jax.ShapeDtypeStruct((seq_p, dkq_p), cdt),
            jax.ShapeDtypeStruct((seq_p, dv_p), cdt),
        ),
        grid_spec=pltpu.PrefetchScalarGridSpec(
            num_scalar_prefetch=0,
            grid=(n_blk,),
            in_specs=[
                pl.BlockSpec((blk, d_in_p), lambda i: (i, 0)),
                pl.BlockSpec((d_in_p, dkq_p), lambda i: (0, 0)),
                pl.BlockSpec((d_in_p, dkq_p), lambda i: (0, 0)),
                pl.BlockSpec((d_in_p, dv_p), lambda i: (0, 0)),
            ],
            out_specs=(
                pl.BlockSpec((blk, dkq_p), lambda i: (i, 0)),
                pl.BlockSpec((blk, dkq_p), lambda i: (i, 0)),
                pl.BlockSpec((blk, dv_p), lambda i: (i, 0)),
            ),
        ),
        compiler_params=pltpu.CompilerParams(dimension_semantics=("parallel",)),
    )(xp, wq, wk, wv)

    # ---- kernel 2: flash-style attention. Grid = (query blocks, key blocks);
    # the key-block axis is the softmax reduction axis (last, "arbitrary").
    out = pl.pallas_call(
        functools.partial(
            _flash_attn_kernel, seq=seq, block_k=blk,
            need_mask=(seq_p != seq),
            approx_recip=(cdt == jnp.dtype(jnp.bfloat16)),
        ),
        out_shape=jax.ShapeDtypeStruct((seq_p, dv_p), f32),
        grid_spec=pltpu.PrefetchScalarGridSpec(
            num_scalar_prefetch=0,
            grid=(n_blk, n_blk),
            in_specs=[
                pl.BlockSpec((blk, dkq_p), lambda qi, ki: (qi, 0)),
                pl.BlockSpec((blk, dkq_p), lambda qi, ki: (ki, 0)),
                pl.BlockSpec((blk, dv_p), lambda qi, ki: (ki, 0)),
            ],
            out_specs=pl.BlockSpec((blk, dv_p), lambda qi, ki: (qi, 0)),
            scratch_shapes=[
                pltpu.VMEM((blk, 1), f32),     # running max m
                pltpu.VMEM((blk, 1), f32),     # running denominator l
                pltpu.VMEM((blk, dv_p), f32),  # output accumulator
            ],
        ),
        compiler_params=pltpu.CompilerParams(
            dimension_semantics=("parallel", "arbitrary")),
    )(q, k, v)

    return out[:seq, :d_out_v]


def self_attention_ref(x, w_query, w_key, w_value):
    """Pure-JAX reference mirroring the PyTorch forward (f32, highest precision)."""
    hi = jax.lax.Precision.HIGHEST
    d_out_kq = w_key.shape[1]
    keys = jnp.dot(x, w_key, precision=hi)
    queries = jnp.dot(x, w_query, precision=hi)
    values = jnp.dot(x, w_value, precision=hi)
    scores = jnp.dot(keys, queries.T, precision=hi)
    weights = jax.nn.softmax(scores / (d_out_kq ** 0.5), axis=0)
    return jnp.dot(weights.T, values, precision=hi)


if __name__ == "__main__":
    # Small deterministic shapes consistent with the module's 2-D input.
    seq, d_in, d_out_kq, d_out_v = 8, 32, 16, 32

    key = jax.random.PRNGKey(0)
    kx, kq, kk, kv = jax.random.split(key, 4)

    x = jax.random.normal(kx, (seq, d_in), dtype=jnp.float32)
    # nn.Parameter(torch.rand(...)) -> uniform [0, 1)
    w_query = jax.random.uniform(kq, (d_in, d_out_kq), dtype=jnp.float32)
    w_key = jax.random.uniform(kk, (d_in, d_out_kq), dtype=jnp.float32)
    w_value = jax.random.uniform(kv, (d_in, d_out_v), dtype=jnp.float32)

    ref = self_attention_ref(x, w_query, w_key, w_value)

    # f32 compute path: tight elementwise check of the kernel structure
    # (tiling, online softmax, masking, deferred normalization).
    out_f32 = jax.block_until_ready(
        self_attention(x, w_query, w_key, w_value, compute_dtype=jnp.float32))
    assert out_f32.shape == (seq, d_out_v)
    assert jnp.allclose(out_f32, ref, atol=2e-3, rtol=2e-3), "f32 kernel mismatch vs reference"

    # Default bf16-MXU-operand path (recommended on v6e/v7x): inputs are quantized
    # to bf16, so check relative Frobenius error against the f32 reference.
    out_bf16 = jax.block_until_ready(self_attention(x, w_query, w_key, w_value))
    assert out_bf16.shape == (seq, d_out_v)
    assert bool(jnp.isfinite(out_bf16).all()), "bf16 kernel produced non-finite values"
    rel_err = float(jnp.linalg.norm(out_bf16 - ref) / (jnp.linalg.norm(ref) + 1e-6))
    assert rel_err < 5e-2, f"bf16 kernel relative error too large: {rel_err:.4f}"

    print("KERNEL_OK")
</pallas_src>

<mosaic_0001>
module attributes {stable_mosaic.version = 11 : i64} {
  func.func @_project_kernel(%arg0: i32, %arg1: memref<8x128xf32, #tpu.memory_space<vmem>>, %arg2: memref<128x128xf32, #tpu.memory_space<vmem>>, %arg3: memref<128x128xf32, #tpu.memory_space<vmem>>, %arg4: memref<128x128xf32, #tpu.memory_space<vmem>>, %arg5: memref<8x128xf32, #tpu.memory_space<vmem>>, %arg6: memref<8x128xf32, #tpu.memory_space<vmem>>, %arg7: memref<8x128xf32, #tpu.memory_space<vmem>>) attributes {dimension_semantics = [#tpu.dimension_semantics<parallel>], iteration_bounds = array<i64: 1>, scalar_prefetch = 0 : i64, scratch_operands = 0 : i64, tpu.core_type = #tpu.core_type<tc>, window_params = [{transform_indices = @transform_0, window_bounds = array<i64: 8, 128>}, {pipeline_mode = #tpu.pipeline_mode<synchronous>, transform_indices = @transform_1, window_bounds = array<i64: 128, 128>}, {pipeline_mode = #tpu.pipeline_mode<synchronous>, transform_indices = @transform_2, window_bounds = array<i64: 128, 128>}, {pipeline_mode = #tpu.pipeline_mode<synchronous>, transform_indices = @transform_3, window_bounds = array<i64: 128, 128>}, {transform_indices = @transform_4, window_bounds = array<i64: 8, 128>}, {transform_indices = @transform_5, window_bounds = array<i64: 8, 128>}, {transform_indices = @transform_6, window_bounds = array<i64: 8, 128>}]} {
    %c0 = arith.constant 0 : index
    %c0_0 = arith.constant 0 : index
    %0 = vector.load %arg1[%c0, %c0_0] : memref<8x128xf32, #tpu.memory_space<vmem>>, vector<8x128xf32>
    %c0_1 = arith.constant 0 : index
    %c0_2 = arith.constant 0 : index
    %1 = vector.load %arg2[%c0_1, %c0_2] : memref<128x128xf32, #tpu.memory_space<vmem>>, vector<128x128xf32>
    %cst = arith.constant dense<0.000000e+00> : vector<8x128xf32>
    %2 = tpu.matmul %0, %1, %cst {dimension_numbers = #tpu.dot_dimension_numbers<[1], [0], [0], [1], [0, 0, 1, 1], [], []>} : vector<8x128xf32>, vector<128x128xf32>, vector<8x128xf32> -> vector<8x128xf32>
    %cst_3 = arith.constant 2.500000e-01 : f32
    %3 = vector.broadcast %cst_3 : f32 to vector<8x128xf32>
    %4 = arith.mulf %2, %3 : vector<8x128xf32>
    %c0_4 = arith.constant 0 : index
    %c0_5 = arith.constant 0 : index
    %5 = vector.load %arg5[%c0_4, %c0_5] : memref<8x128xf32, #tpu.memory_space<vmem>>, vector<8x128xf32>
    tpu.vector_store %arg5[%c0_4, %c0_5], %4 {strides = array<i32>} : memref<8x128xf32, #tpu.memory_space<vmem>>, vector<8x128xf32>,
    %c0_6 = arith.constant 0 : index
    %c0_7 = arith.constant 0 : index
    %6 = vector.load %arg3[%c0_6, %c0_7] : memref<128x128xf32, #tpu.memory_space<vmem>>, vector<128x128xf32>
    %cst_8 = arith.constant dense<0.000000e+00> : vector<8x128xf32>
    %7 = tpu.matmul %0, %6, %cst_8 {dimension_numbers = #tpu.dot_dimension_numbers<[1], [0], [0], [1], [0, 0, 1, 1], [], []>} : vector<8x128xf32>, vector<128x128xf32>, vector<8x128xf32> -> vector<8x128xf32>
    %c0_9 = arith.constant 0 : index
    %c0_10 = arith.constant 0 : index
    %8 = vector.load %arg6[%c0_9, %c0_10] : memref<8x128xf32, #tpu.memory_space<vmem>>, vector<8x128xf32>
    tpu.vector_store %arg6[%c0_9, %c0_10], %7 {strides = array<i32>} : memref<8x128xf32, #tpu.memory_space<vmem>>, vector<8x128xf32>,
    %c0_11 = arith.constant 0 : index
    %c0_12 = arith.constant 0 : index
    %9 = vector.load %arg4[%c0_11, %c0_12] : memref<128x128xf32, #tpu.memory_space<vmem>>, vector<128x128xf32>
    %cst_13 = arith.constant dense<0.000000e+00> : vector<8x128xf32>
    %10 = tpu.matmul %0, %9, %cst_13 {dimension_numbers = #tpu.dot_dimension_numbers<[1], [0], [0], [1], [0, 0, 1, 1], [], []>} : vector<8x128xf32>, vector<128x128xf32>, vector<8x128xf32> -> vector<8x128xf32>
    %c0_14 = arith.constant 0 : index
    %c0_15 = arith.constant 0 : index
    %11 = vector.load %arg7[%c0_14, %c0_15] : memref<8x128xf32, #tpu.memory_space<vmem>>, vector<8x128xf32>
    tpu.vector_store %arg7[%c0_14, %c0_15], %10 {strides = array<i32>} : memref<8x128xf32, #tpu.memory_space<vmem>>, vector<8x128xf32>,
    return
  }
  func.func @transform_0(%arg0: i32) -> (i32, i32) {
    %c0_i32 = arith.constant 0 : i32
    %c0_i32_0 = arith.constant 0 : i32
    return %arg0, %c0_i32 : i32, i32
  }
  func.func @transform_1(%arg0: i32) -> (i32, i32) {
    %c0_i32 = arith.constant 0 : i32
    %c0_i32_0 = arith.constant 0 : i32
    %c0_i32_1 = arith.constant 0 : i32
    return %c0_i32, %c0_i32_0 : i32, i32
  }
  func.func @transform_2(%arg0: i32) -> (i32, i32) {
    %c0_i32 = arith.constant 0 : i32
    %c0_i32_0 = arith.constant 0 : i32
    %c0_i32_1 = arith.constant 0 : i32
    return %c0_i32, %c0_i32_0 : i32, i32
  }
  func.func @transform_3(%arg0: i32) -> (i32, i32) {
    %c0_i32 = arith.constant 0 : i32
    %c0_i32_0 = arith.constant 0 : i32
    %c0_i32_1 = arith.constant 0 : i32
    return %c0_i32, %c0_i32_0 : i32, i32
  }
  func.func @transform_4(%arg0: i32) -> (i32, i32) {
    %c0_i32 = arith.constant 0 : i32
    %c0_i32_0 = arith.constant 0 : i32
    return %arg0, %c0_i32 : i32, i32
  }
  func.func @transform_5(%arg0: i32) -> (i32, i32) {
    %c0_i32 = arith.constant 0 : i32
    %c0_i32_0 = arith.constant 0 : i32
    return %arg0, %c0_i32 : i32, i32
  }
  func.func @transform_6(%arg0: i32) -> (i32, i32) {
    %c0_i32 = arith.constant 0 : i32
    %c0_i32_0 = arith.constant 0 : i32
    return %arg0, %c0_i32 : i32, i32
  }
}

</mosaic_0001>

<bundles_post_ra>
// kernel: tpu_custom_call.1
= control target key start
LH: loop header
LB: loop body
LE: loop exit
PB: predicated region body
PF: predicated region fallthrough
CT: control target
= control target key end

     0   :  { %12 = vsyncpa [#allocation3], 0  ;;  %s498_s0 = inlined_call_operand.hbm [shape: f32[8,128], index: 0, kind: input, shape index: {}]   ;;  %s499_s1 = inlined_call_operand.hbm [shape: f32[128,128], index: 1, kind: input, shape index: {}]   ;;  %s500_s2 = inlined_call_operand.hbm [shape: f32[128,128], index: 2, kind: input, shape index: {}]   ;;  %s501_s3 = inlined_call_operand.hbm [shape: f32[128,128], index: 3, kind: input, shape index: {}]   ;;  %s502_s4 = inlined_call_operand.hbm [shape: f32[8,128], index: 4, kind: output, shape index: {0}]   ;;  %s503_s5 = inlined_call_operand.hbm [shape: f32[8,128], index: 5, kind: output, shape index: {1}]   ;;  %s504_s6 = inlined_call_operand.hbm [shape: f32[8,128], index: 6, kind: output, shape index: {2}]  }
   0x1   :  { %13 = vsyncpa [#allocation6], 0 }
   0x2   :  { %14 = vsyncpa [#allocation9], 0 }
   0x3   :  { %15 = vsyncpa [#allocation4], 0  ;;  %s32_s23 = sshll.u32 %s499_s1, 4  ;;  %s33_s23 = int_to_ptr.hbm [resolvable:$true] %s32_s23 }
   0x4   :  { %16 = vsyncpa [#allocation12], 0  ;;  %s433_s24 = smov [#allocation5]   ;;  %s22_s28 = sshll.u32 %s498_s0, 4  ;;  %s23_s28 = int_to_ptr.hbm [resolvable:$true] %s22_s28 }
   0x5   :  { %s34_s25 = sshll.u32 %s433_s24, 4  ;;  %s434_s29 = smov 128   ;;  %s35_s25 = int_to_ptr.vmem [resolvable:$true] %s34_s25 }
   0x6   :  { %s435_s30 = smov 8   ;;  %s436_s7 = smov [#allocation2]  }
   0x7   :  { %40 = dma.hbm_to_vmem [thread:$0]  %s33_s23, 2048, %s35_s25, [#allocation6], %s434_s29, %s434_s29, %s435_s30  }
   0x8   :  { %s24_s8 = sshll.u32 %s436_s7, 4  ;;  %s45_s11 = sshll.u32 %s500_s2, 4  ;;  %s25_s8 = int_to_ptr.vmem [resolvable:$true] %s24_s8  ;;  %s46_s11 = int_to_ptr.hbm [resolvable:$true] %s45_s11 }
   0x9   :  { %27 = dma.hbm_to_vmem [thread:$0]  %s23_s28, 128, %s25_s8, [#allocation3]  }
   0xa   :  { %s58_s13 = sshll.u32 %s501_s3, 4  ;;  %s437_s14 = smov [#allocation7]   ;;  %s59_s13 = int_to_ptr.hbm [resolvable:$true] %s58_s13 }
   0xb   :  { %s47_s15 = sshll.u32 %s437_s14, 4  ;;  %s438_s0 = smov [#allocation8]   ;;  %s48_s15 = int_to_ptr.vmem [resolvable:$true] %s47_s15 }
   0xc   :  { %53 = dma.hbm_to_vmem [thread:$0]  %s46_s11, 2048, %s48_s15, [#allocation6], %s434_s29, %s434_s29, %s435_s30  }
   0xd   :  { %s60_s16 = sshll.u32 %s438_s0, 4  ;;  %s61_s16 = int_to_ptr.vmem [resolvable:$true] %s60_s16 }
   0xe   :  { %66 = dma.hbm_to_vmem [thread:$0]  %s59_s13, 2048, %s61_s16, [#allocation9], %s434_s29, %s434_s29, %s435_s30  }
   0xf   :  { %423 = dma.done.wait [#allocation3], 128  }
  0x10   :  { %424 = vsyncadd [#allocation3], 4294967168 }
  0x11   :  { %425 = dma.done.wait [#allocation6], 4096  }
  0x12   :  { %426 = vsyncadd [#allocation6], 4294963200 }
  0x13   :  { %427 = dma.done.wait [#allocation9], 2048  }
  0x14   :  { %428 = vsyncadd [#allocation9], 4294965248  ;;  %v174_v0 = vld [vmem:[#allocation8 + $0x78] sm:$0xff]  ;;  %v173_v1 = vld [vmem:[#allocation8 + $0x70] sm:$0xff]  ;;  %s439_s2 = smov [#allocation10]   ;;  %s203_s19 = sshll.u32 %s502_s4, 4  ;;  %s204_s19 = int_to_ptr.hbm [resolvable:$true] %s203_s19 }
  0x15   :  { %v99_v2 = vld [vmem:[#allocation5 + $0x78] sm:$0xff]  ;;  %175 = vmatpush.msra.mxu2 %v174_v0  ;;  %v98_v4 = vld [vmem:[#allocation5 + $0x70] sm:$0xff]  ;;  %v172_v5 = vld [vmem:[#allocation8 + $0x68] sm:$0xff]  ;;  %s201_s3 = sshll.u32 %s439_s2, 4  ;;  %s440_s20 = smov [#allocation11]   ;;  %s202_s3 = int_to_ptr.vmem [resolvable:$true] %s201_s3 }
  0x16   :  { %100 = vmatpush.msra.mxu0 %v99_v2  ;;  %v137_v3 = vld [vmem:[#allocation7 + $0x78] sm:$0xff]  ;;  %v136_v6 = vld [vmem:[#allocation7 + $0x70] sm:$0xff]  ;;  %v97_v7 = vld [vmem:[#allocation5 + $0x68] sm:$0xff]  ;;  %s212_s21 = sshll.u32 %s440_s20, 4  ;;  %s214_s24 = sshll.u32 %s503_s5, 4  ;;  %s213_s21 = int_to_ptr.vmem [resolvable:$true] %s212_s21  ;;  %s215_s24 = int_to_ptr.hbm [resolvable:$true] %s214_s24 }
  0x17   :  { %138 = vmatpush.msra.mxu1 %v137_v3  ;;  %176 = vmatpush.msra.mxu2 %v173_v1  ;;  %v135_v8 = vld [vmem:[#allocation7 + $0x68] sm:$0xff]  ;;  %v171_v9 = vld [vmem:[#allocation8 + $0x60] sm:$0xff]  ;;  %v170_v12 = vld [vmem:[#allocation8 + $0x58] sm:$0xff]  ;;  %s441_s25 = smov [#allocation13]   ;;  %s225_s29 = sshll.u32 %s504_s6, 4  ;;  %s226_s29 = int_to_ptr.hbm [resolvable:$true] %s225_s29 }
  0x18   :  { %101 = vmatpush.msra.mxu0 %v98_v4  ;;  %v96_v10 = vld [vmem:[#allocation5 + $0x60] sm:$0xff]  ;;  %v95_v13 = vld [vmem:[#allocation5 + $0x58] sm:$0xff]  ;;  %v169_v15 = vld [vmem:[#allocation8 + $0x50] sm:$0xff]  ;;  %s223_s26 = sshll.u32 %s441_s25, 4  ;;  %s224_s26 = int_to_ptr.vmem [resolvable:$true] %s223_s26 }
  0x19   :  { %139 = vmatpush.msra.mxu1 %v136_v6  ;;  %177 = vmatpush.msra.mxu2 %v172_v5  ;;  %v134_v11 = vld [vmem:[#allocation7 + $0x60] sm:$0xff]  ;;  %v133_v14 = vld [vmem:[#allocation7 + $0x58] sm:$0xff]  ;;  %v94_v16 = vld [vmem:[#allocation5 + $0x50] sm:$0xff] }
  0x1a   :  { %102 = vmatpush.msra.mxu0 %v97_v7  ;;  %v132_v17 = vld [vmem:[#allocation7 + $0x50] sm:$0xff]  ;;  %v168_v18 = vld [vmem:[#allocation8 + $0x48] sm:$0xff]  ;;  %v167_v21 = vld [vmem:[#allocation8 + $0x40] sm:$0xff] }
  0x1b   :  { %140 = vmatpush.msra.mxu1 %v135_v8  ;;  %178 = vmatpush.msra.mxu2 %v171_v9  ;;  %v93_v19 = vld [vmem:[#allocation5 + $0x48] sm:$0xff]  ;;  %v92_v22 = vld [vmem:[#allocation5 + $0x40] sm:$0xff]  ;;  %v166_v24 = vld [vmem:[#allocation8 + $0x38] sm:$0xff] }
  0x1c   :  { %103 = vmatpush.msra.mxu0 %v96_v10  ;;  %v131_v20 = vld [vmem:[#allocation7 + $0x48] sm:$0xff]  ;;  %v130_v23 = vld [vmem:[#allocation7 + $0x40] sm:$0xff]  ;;  %v91_v25 = vld [vmem:[#allocation5 + $0x38] sm:$0xff] }
  0x1d   :  { %141 = vmatpush.msra.mxu1 %v134_v11  ;;  %179 = vmatpush.msra.mxu2 %v170_v12  ;;  %v129_v26 = vld [vmem:[#allocation7 + $0x38] sm:$0xff]  ;;  %v165_v27 = vld [vmem:[#allocation8 + $0x30] sm:$0xff]  ;;  %v164_v30 = vld [vmem:[#allocation8 + $0x28] sm:$0xff] }
  0x1e   :  { %104 = vmatpush.msra.mxu0 %v95_v13  ;;  %v90_v28 = vld [vmem:[#allocation5 + $0x30] sm:$0xff]  ;;  %v89_v31 = vld [vmem:[#allocation5 + $0x28] sm:$0xff]  ;;  %v163_v33 = vld [vmem:[#allocation8 + $0x20] sm:$0xff] }
  0x1f   :  { %142 = vmatpush.msra.mxu1 %v133_v14  ;;  %180 = vmatpush.msra.mxu2 %v169_v15  ;;  %v128_v29 = vld [vmem:[#allocation7 + $0x30] sm:$0xff]  ;;  %v127_v32 = vld [vmem:[#allocation7 + $0x28] sm:$0xff]  ;;  %v88_v34 = vld [vmem:[#allocation5 + $0x20] sm:$0xff] }
  0x20   :  { %105 = vmatpush.msra.mxu0 %v94_v16  ;;  %v126_v35 = vld [vmem:[#allocation7 + $0x20] sm:$0xff]  ;;  %v162_v36 = vld [vmem:[#allocation8 + $0x18] sm:$0xff]  ;;  %v161_v39 = vld [vmem:[#allocation8 + $0x10] sm:$0xff] }
  0x21   :  { %143 = vmatpush.msra.mxu1 %v132_v17  ;;  %181 = vmatpush.msra.mxu2 %v168_v18  ;;  %v87_v37 = vld [vmem:[#allocation5 + $0x18] sm:$0xff]  ;;  %v86_v40 = vld [vmem:[#allocation5 + $0x10] sm:$0xff]  ;;  %v160_v42 = vld [vmem:[#allocation8 + $0x8] sm:$0xff] }
  0x22   :  { %106 = vmatpush.msra.mxu0 %v93_v19  ;;  %v125_v38 = vld [vmem:[#allocation7 + $0x18] sm:$0xff]  ;;  %v124_v41 = vld [vmem:[#allocation7 + $0x10] sm:$0xff]  ;;  %v85_v43 = vld [vmem:[#allocation5 + $0x8] sm:$0xff] }
  0x23   :  { %144 = vmatpush.msra.mxu1 %v131_v20  ;;  %182 = vmatpush.msra.mxu2 %v167_v21  ;;  %v123_v44 = vld [vmem:[#allocation7 + $0x8] sm:$0xff]  ;;  %v159_v45 = vld [vmem:[#allocation8] sm:$0xff]  ;;  %v83_v47 = vld [vmem:[#allocation2] sm:$0xff] }
  0x24   :  { %107 = vmatpush.msra.mxu0 %v92_v22  ;;  %v84_v46 = vld [vmem:[#allocation5] sm:$0xff] }
  0x25   :  { %145 = vmatpush.msra.mxu1 %v130_v23  ;;  %183 = vmatpush.msra.mxu2 %v166_v24  ;;  %v122_v48 = vld [vmem:[#allocation7] sm:$0xff] }
  0x26   :  { %108 = vmatpush.msra.mxu0 %v91_v25 }
  0x27   :  { %146 = vmatpush.msra.mxu1 %v129_v26  ;;  %184 = vmatpush.msra.mxu2 %v165_v27 }
  0x28   :  { %109 = vmatpush.msra.mxu0 %v90_v28 }
  0x29   :  { %147 = vmatpush.msra.mxu1 %v128_v29  ;;  %185 = vmatpush.msra.mxu2 %v164_v30 }
  0x2a   :  { %110 = vmatpush.msra.mxu0 %v89_v31 }
  0x2b   :  { %148 = vmatpush.msra.mxu1 %v127_v32  ;;  %186 = vmatpush.msra.mxu2 %v163_v33 }
  0x2c   :  { %111 = vmatpush.msra.mxu0 %v88_v34 }
  0x2d   :  { %149 = vmatpush.msra.mxu1 %v126_v35  ;;  %187 = vmatpush.msra.mxu2 %v162_v36 }
  0x2e   :  { %112 = vmatpush.msra.mxu0 %v87_v37 }
  0x2f   :  { %150 = vmatpush.msra.mxu1 %v125_v38  ;;  %188 = vmatpush.msra.mxu2 %v161_v39 }
  0x30   :  { %113 = vmatpush.msra.mxu0 %v86_v40 }
  0x31   :  { %151 = vmatpush.msra.mxu1 %v124_v41  ;;  %189 = vmatpush.msra.mxu2 %v160_v42 }
  0x32   :  { %114 = vmatpush.msra.mxu0 %v85_v43 }
  0x33   :  { %152 = vmatpush.msra.mxu1 %v123_v44  ;;  %190 = vmatpush.msra.mxu2 %v159_v45 }
  0x34   :  { %115 = vmatpush.msra.mxu0 %v84_v46  ;;  %191 = vmatmul.f32.vlgmr.msra.gmra.mxu2 %v83_v47 }
  0x35   :  { %116 = vmatmul.f32.vlgmr.msra.gmra.mxu0 %v83_v47  ;;  %153 = vmatpush.msra.mxu1 %v122_v48 }
  0x36   :  { %154 = vmatmul.f32.vlgmr.msra.gmra.mxu1 %v83_v47 }
  0xb2   :  { %v117_v49 = vpop.f32.mrf.mxu0 }
  0xb3   :  { %v120_v50 = vmul.f32 0.25, %v117_v49  ;;  %v155_v51 = vpop.f32.mrf.mxu1 }
  0xb4   :  { %158 = vst [vmem:[#allocation11] sm:$0xff] %v155_v51 }
  0xb5   :  { %121 = vst [vmem:[#allocation10] sm:$0xff] %v120_v50  ;;  %217 = dma.vmem_to_hbm [thread:$0]  %s213_s21, 128, %s215_s24, [#allocation12]  }
  0xb6   :  { %206 = dma.vmem_to_hbm [thread:$0]  %s202_s3, 128, %s204_s19, [#allocation4]  }
  0xb7   :  { %v192_v52 = vpop.f32.mrf.mxu2 }
  0xb8   :  { %195 = vst [vmem:[#allocation13] sm:$0xff] %v192_v52 }
  0xb9   :  { %228 = dma.vmem_to_hbm [thread:$0]  %s224_s26, 128, %s226_s29, [#allocation12]  }
  0xba   :  { %429 = dma.done.wait [#allocation4], 128  }
  0xbb   :  { %430 = vsyncadd [#allocation4], 4294967168 }
  0xbc   :  { %431 = dma.done.wait [#allocation12], 256  }
  0xbd   :  { %432 = vsyncadd [#allocation12], 4294967040 }
  0xbe   :  { %241 = vsyncpa [#allocation3], 1 }
  0xbf   :  { %242 = vsyncpa [#allocation6], 1 }
  0xc0   :  { %243 = vsyncpa [#allocation9], 1 }
  0xc1   :  { %244 = vsyncpa [#allocation4], 1 }
  0xc2   :  { %245 = vsyncpa [#allocation12], 1 }

</bundles_post_ra>
